<compile_context>
chip_gen: v7x
topology: tpu7x:2x2x1
jax: 0.10.0
libtpu: 0.0.40
codegen_flags: <defaults>
</compile_context>

<pallas_src>
import functools
import math

import jax
import jax.numpy as jnp
from jax import lax
from jax.experimental import pallas as pl
from jax.experimental.pallas import tpu as pltpu


def _round_up(x, m):
    return ((x + m - 1) // m) * m


def _resblock_kernel(xe_ref, w1_ref, b1_ref, w2_ref, b2_ref, mask_ref, out_ref,
                     *, Wp, K, L2, S_out, base, resid, neg_slope):
    """One group of G packed images per grid step.

    xe_ref   : (GC, Lext)     zero-halo'd inputs, flat padded spatial on lanes,
                              G images' channels stacked on sublanes (GC = G*C)
    w*_ref   : (K*K*GC, GC)   per-tap block-diagonal (GC_out, GC_in) weights,
                              stacked tap-major along the sublane axis
    b*_ref   : (GC, 1)        packed biases
    mask_ref : (1, L2)        1.0 on the image interior of the slab, else 0.0
    out_ref  : (GC, S_out)    S_out = round_up(H*Wp, 128)  (lane-dense output)
    """
    GC = out_ref.shape[0]
    xe = xe_ref[...].astype(jnp.float32)                  # (GC, Lext)

    def conv(src, w_ref, b_ref, start0, n_pos):
        # K*K per-tap (GC,GC) @ (GC,n_pos) MXU matmuls, f32 accumulation.
        # One partial accumulator per kernel row keeps the add chains short.
        row_accs = []
        for kh in range(K):
            acc = None
            for kw in range(K):
                t = kh * K + kw
                s = start0 + kh * Wp + kw
                patch = src[:, s:s + n_pos]               # (GC, n_pos)
                prod = jnp.dot(w_ref[t * GC:(t + 1) * GC, :], patch,
                               preferred_element_type=jnp.float32)
                acc = prod if acc is None else acc + prod
            row_accs.append(acc)
        total = row_accs[0]
        for ra in row_accs[1:]:
            total = total + ra
        return total + b_ref[...]                         # bias column broadcast

    # ---- conv1 over the whole halo'd slab; the interior mask turns it into
    #      the zero-padded intermediate (halo anchors are garbage, zeroed by
    #      the mask), so no scratch round trip is needed.
    h = conv(xe, w1_ref, b1_ref, base, L2)
    h = jnp.where(h > 0, h, neg_slope * h)                # LeakyReLU(0.1)
    hp = h * mask_ref[...]                                # (GC, L2)

    # ---- conv2 over (lane-padded) output anchors + residual add.
    #      The residual slice start `resid` is 128-aligned (whole vregs).
    y = conv(hp, w2_ref, b2_ref, 0, S_out) + xe[:, resid:resid + S_out]
    out_ref[...] = y.astype(out_ref.dtype)


def resblock_pallas(x_nchw, w1, b1, w2, b2, *, neg_slope=0.1):
    """x_nchw: (N,C,H,W), w*: (K,K,Cin,Cout) HWIO, b*: (C,). Returns (N,C,H,W)."""
    N, C, H, W = x_nchw.shape
    K = w1.shape[0]
    p = K // 2
    Wp = W + 2 * p
    off0 = p * Wp + p                  # slab offset of original pixel (0, 0)
    S = H * Wp                         # output-anchored positions (w/ row slack)
    S_out = _round_up(S, 128)          # lane-dense output width (unmasked vst)
    L2 = _round_up(S_out + (K - 1) * (Wp + 1), 128)   # conv1 evaluation range
    resid = _round_up(2 * off0, 128)   # 128-aligned residual slice start
    F = resid - off0                   # flat front pad of the input slab
    base = F - off0                    # conv1 anchor offset into xe
    Lext = _round_up(max(base + (K - 1) * (Wp + 1) + L2, resid + S_out), 128)

    # pack G images' channels onto the 8 f32 sublanes per grid step
    G = math.gcd(N, max(1, 8 // C))
    if (G * C) % 8 != 0:
        G = N                          # fall back to a single full-array block
    GC, NG = G * C, N // G

    # ---- layout glue (plain JAX) -------------------------------------------
    # width halo, then ONE flat pad supplying top/bottom halo rows, the
    # 128-alignment front pad and the back slack.
    xw = jnp.pad(x_nchw, ((0, 0), (0, 0), (0, 0), (p, p)))       # (N,C,H,Wp)
    xflat = xw.reshape(N * C, H * Wp)
    xext = jnp.pad(xflat, ((0, 0), (F + p * Wp, Lext - (F + p * Wp) - H * Wp)))

    # per-tap (Cout,Cin) weights, block-diagonal over the G packed images,
    # stacked tap-major on sublanes -> (K*K*GC, GC)
    eye_g = jnp.eye(G, dtype=jnp.float32)

    def pack_w(w):
        taps = jnp.transpose(w.reshape(K * K, C, C), (0, 2, 1)).astype(jnp.float32)
        bd = jnp.einsum('gh,toi->tgohi', eye_g, taps)            # (T,G,Co,G,Ci)
        return bd.reshape(K * K * GC, GC)

    def pack_b(b):
        return jnp.tile(b.astype(jnp.float32), G).reshape(GC, 1)

    # interior mask over the conv1 evaluation range (1 inside the image)
    jj = jnp.arange(L2)
    row, col = jj // Wp, jj % Wp
    mask = (((row >= p) & (row < p + H) & (col >= p) & (col < p + W))
            .astype(jnp.float32).reshape(1, L2))

    kernel = functools.partial(_resblock_kernel, Wp=Wp, K=K, L2=L2, S_out=S_out,
                               base=base, resid=resid, neg_slope=neg_slope)

    out_flat = pl.pallas_call(
        kernel,
        out_shape=jax.ShapeDtypeStruct((N * C, S_out), x_nchw.dtype),
        grid_spec=pltpu.PrefetchScalarGridSpec(
            num_scalar_prefetch=0,
            grid=(NG,),
            in_specs=[
                pl.BlockSpec((GC, Lext), lambda g: (g, 0)),
                pl.BlockSpec((K * K * GC, GC), lambda g: (0, 0)),
                pl.BlockSpec((GC, 1), lambda g: (0, 0)),
                pl.BlockSpec((K * K * GC, GC), lambda g: (0, 0)),
                pl.BlockSpec((GC, 1), lambda g: (0, 0)),
                pl.BlockSpec((1, L2), lambda g: (0, 0)),
            ],
            out_specs=pl.BlockSpec((GC, S_out), lambda g: (g, 0)),
        ),
        compiler_params=pltpu.CompilerParams(
            dimension_semantics=("parallel",)),
    )(xext, pack_w(w1), pack_b(b1), pack_w(w2), pack_b(b2), mask)

    # drop the lane padding and per-row slack: (N*C, S_out) -> (N, C, H, W)
    return out_flat[:, :S].reshape(N, C, H, Wp)[..., :W]


def resblock_ref(x, w1, b1, w2, b2, *, neg_slope=0.1):
    """Pure-JAX reference (lax conv, NCHW) for correctness checking."""
    dn = lax.conv_dimension_numbers(x.shape, w1.shape, ('NCHW', 'HWIO', 'NCHW'))
    h = lax.conv_general_dilated(x, w1, (1, 1), 'SAME', dimension_numbers=dn,
                                 precision=lax.Precision.HIGHEST)
    h = h + b1.reshape(1, -1, 1, 1)
    h = jnp.where(h > 0, h, neg_slope * h)
    r = lax.conv_general_dilated(h, w2, (1, 1), 'SAME', dimension_numbers=dn,
                                 precision=lax.Precision.HIGHEST)
    r = r + b2.reshape(1, -1, 1, 1)
    return r + x


if __name__ == "__main__":
    # Small, PyTorch-consistent shapes: N=2, n_feats=4, H=W=16, kernel_size=3
    N, C, H, W, K = 2, 4, 16, 16, 3

    key = jax.random.PRNGKey(0)
    kx, kw1, kb1, kw2, kb2 = jax.random.split(key, 5)

    # input in PyTorch NCHW convention
    x = jax.random.normal(kx, (N, C, H, W), dtype=jnp.float32)

    # synthetic parameters, created directly in HWIO for the kernel
    w1 = jax.random.normal(kw1, (K, K, C, C), dtype=jnp.float32) * 0.1
    b1 = jax.random.normal(kb1, (C,), dtype=jnp.float32) * 0.1
    w2 = jax.random.normal(kw2, (K, K, C, C), dtype=jnp.float32) * 0.1
    b2 = jax.random.normal(kb2, (C,), dtype=jnp.float32) * 0.1

    out = jax.jit(resblock_pallas)(x, w1, b1, w2, b2)
    out = jax.block_until_ready(out)
    assert out.shape == (N, C, H, W)

    # correctness check vs pure-JAX reference
    ref = resblock_ref(x, w1, b1, w2, b2)
    err = float(jnp.max(jnp.abs(out - ref)))
    assert jnp.allclose(out, ref, rtol=1e-3, atol=1e-3), err

    print("KERNEL_OK")
</pallas_src>

<mosaic_0001>
module attributes {stable_mosaic.version = 11 : i64} {
  func.func @_resblock_kernel(%arg0: i32, %arg1: memref<8x640xf32, #tpu.memory_space<vmem>>, %arg2: memref<72x8xf32, #tpu.memory_space<vmem>>, %arg3: memref<8x1xf32, #tpu.memory_space<vmem>>, %arg4: memref<72x8xf32, #tpu.memory_space<vmem>>, %arg5: memref<8x1xf32, #tpu.memory_space<vmem>>, %arg6: memref<1x512xf32, #tpu.memory_space<vmem>>, %arg7: memref<8x384xf32, #tpu.memory_space<vmem>>) attributes {dimension_semantics = [#tpu.dimension_semantics<parallel>], iteration_bounds = array<i64: 1>, scalar_prefetch = 0 : i64, scratch_operands = 0 : i64, tpu.core_type = #tpu.core_type<tc>, window_params = [{transform_indices = @transform_0, window_bounds = array<i64: 8, 640>}, {pipeline_mode = #tpu.pipeline_mode<synchronous>, transform_indices = @transform_1, window_bounds = array<i64: 72, 8>}, {pipeline_mode = #tpu.pipeline_mode<synchronous>, transform_indices = @transform_2, window_bounds = array<i64: 8, 1>}, {pipeline_mode = #tpu.pipeline_mode<synchronous>, transform_indices = @transform_3, window_bounds = array<i64: 72, 8>}, {pipeline_mode = #tpu.pipeline_mode<synchronous>, transform_indices = @transform_4, window_bounds = array<i64: 8, 1>}, {pipeline_mode = #tpu.pipeline_mode<synchronous>, transform_indices = @transform_5, window_bounds = array<i64: 1, 512>}, {transform_indices = @transform_6, window_bounds = array<i64: 8, 384>}]} {
    %c0 = arith.constant 0 : index
    %c0_0 = arith.constant 0 : index
    %0 = vector.load %arg1[%c0, %c0_0] : memref<8x640xf32, #tpu.memory_space<vmem>>, vector<8x640xf32>
    %1 = vector.extract_strided_slice %0 {offsets = [0, 90], sizes = [8, 512], strides = [1, 1]} : vector<8x640xf32> to vector<8x512xf32>
    %c0_1 = arith.constant 0 : index
    %c0_2 = arith.constant 0 : index
    %2 = vector.load %arg2[%c0_1, %c0_2] : memref<72x8xf32, #tpu.memory_space<vmem>>, vector<8x8xf32>
    %cst = arith.constant dense<0.000000e+00> : vector<8x512xf32>
    %3 = tpu.matmul %2, %1, %cst {dimension_numbers = #tpu.dot_dimension_numbers<[1], [0], [0], [1], [0, 0, 1, 1], [], []>} : vector<8x8xf32>, vector<8x512xf32>, vector<8x512xf32> -> vector<8x512xf32>
    %4 = vector.extract_strided_slice %0 {offsets = [0, 91], sizes = [8, 512], strides = [1, 1]} : vector<8x640xf32> to vector<8x512xf32>
    %c8 = arith.constant 8 : index
    %c0_3 = arith.constant 0 : index
    %5 = vector.load %arg2[%c8, %c0_3] : memref<72x8xf32, #tpu.memory_space<vmem>>, vector<8x8xf32>
    %cst_4 = arith.constant dense<0.000000e+00> : vector<8x512xf32>
    %6 = tpu.matmul %5, %4, %cst_4 {dimension_numbers = #tpu.dot_dimension_numbers<[1], [0], [0], [1], [0, 0, 1, 1], [], []>} : vector<8x8xf32>, vector<8x512xf32>, vector<8x512xf32> -> vector<8x512xf32>
    %7 = arith.addf %3, %6 : vector<8x512xf32>
    %8 = vector.extract_strided_slice %0 {offsets = [0, 92], sizes = [8, 512], strides = [1, 1]} : vector<8x640xf32> to vector<8x512xf32>
    %c16 = arith.constant 16 : index
    %c0_5 = arith.constant 0 : index
    %9 = vector.load %arg2[%c16, %c0_5] : memref<72x8xf32, #tpu.memory_space<vmem>>, vector<8x8xf32>
    %cst_6 = arith.constant dense<0.000000e+00> : vector<8x512xf32>
    %10 = tpu.matmul %9, %8, %cst_6 {dimension_numbers = #tpu.dot_dimension_numbers<[1], [0], [0], [1], [0, 0, 1, 1], [], []>} : vector<8x8xf32>, vector<8x512xf32>, vector<8x512xf32> -> vector<8x512xf32>
    %11 = arith.addf %7, %10 : vector<8x512xf32>
    %12 = vector.extract_strided_slice %0 {offsets = [0, 108], sizes = [8, 512], strides = [1, 1]} : vector<8x640xf32> to vector<8x512xf32>
    %c24 = arith.constant 24 : index
    %c0_7 = arith.constant 0 : index
    %13 = vector.load %arg2[%c24, %c0_7] : memref<72x8xf32, #tpu.memory_space<vmem>>, vector<8x8xf32>
    %cst_8 = arith.constant dense<0.000000e+00> : vector<8x512xf32>
    %14 = tpu.matmul %13, %12, %cst_8 {dimension_numbers = #tpu.dot_dimension_numbers<[1], [0], [0], [1], [0, 0, 1, 1], [], []>} : vector<8x8xf32>, vector<8x512xf32>, vector<8x512xf32> -> vector<8x512xf32>
    %15 = vector.extract_strided_slice %0 {offsets = [0, 109], sizes = [8, 512], strides = [1, 1]} : vector<8x640xf32> to vector<8x512xf32>
    %c32 = arith.constant 32 : index
    %c0_9 = arith.constant 0 : index
    %16 = vector.load %arg2[%c32, %c0_9] : memref<72x8xf32, #tpu.memory_space<vmem>>, vector<8x8xf32>
    %cst_10 = arith.constant dense<0.000000e+00> : vector<8x512xf32>
    %17 = tpu.matmul %16, %15, %cst_10 {dimension_numbers = #tpu.dot_dimension_numbers<[1], [0], [0], [1], [0, 0, 1, 1], [], []>} : vector<8x8xf32>, vector<8x512xf32>, vector<8x512xf32> -> vector<8x512xf32>
    %18 = arith.addf %14, %17 : vector<8x512xf32>
    %19 = vector.extract_strided_slice %0 {offsets = [0, 110], sizes = [8, 512], strides = [1, 1]} : vector<8x640xf32> to vector<8x512xf32>
    %c40 = arith.constant 40 : index
    %c0_11 = arith.constant 0 : index
    %20 = vector.load %arg2[%c40, %c0_11] : memref<72x8xf32, #tpu.memory_space<vmem>>, vector<8x8xf32>
    %cst_12 = arith.constant dense<0.000000e+00> : vector<8x512xf32>
    %21 = tpu.matmul %20, %19, %cst_12 {dimension_numbers = #tpu.dot_dimension_numbers<[1], [0], [0], [1], [0, 0, 1, 1], [], []>} : vector<8x8xf32>, vector<8x512xf32>, vector<8x512xf32> -> vector<8x512xf32>
    %22 = arith.addf %18, %21 : vector<8x512xf32>
    %23 = vector.extract_strided_slice %0 {offsets = [0, 126], sizes = [8, 512], strides = [1, 1]} : vector<8x640xf32> to vector<8x512xf32>
    %c48 = arith.constant 48 : index
    %c0_13 = arith.constant 0 : index
    %24 = vector.load %arg2[%c48, %c0_13] : memref<72x8xf32, #tpu.memory_space<vmem>>, vector<8x8xf32>
    %cst_14 = arith.constant dense<0.000000e+00> : vector<8x512xf32>
    %25 = tpu.matmul %24, %23, %cst_14 {dimension_numbers = #tpu.dot_dimension_numbers<[1], [0], [0], [1], [0, 0, 1, 1], [], []>} : vector<8x8xf32>, vector<8x512xf32>, vector<8x512xf32> -> vector<8x512xf32>
    %26 = vector.extract_strided_slice %0 {offsets = [0, 127], sizes = [8, 512], strides = [1, 1]} : vector<8x640xf32> to vector<8x512xf32>
    %c56 = arith.constant 56 : index
    %c0_15 = arith.constant 0 : index
    %27 = vector.load %arg2[%c56, %c0_15] : memref<72x8xf32, #tpu.memory_space<vmem>>, vector<8x8xf32>
    %cst_16 = arith.constant dense<0.000000e+00> : vector<8x512xf32>
    %28 = tpu.matmul %27, %26, %cst_16 {dimension_numbers = #tpu.dot_dimension_numbers<[1], [0], [0], [1], [0, 0, 1, 1], [], []>} : vector<8x8xf32>, vector<8x512xf32>, vector<8x512xf32> -> vector<8x512xf32>
    %29 = arith.addf %25, %28 : vector<8x512xf32>
    %30 = vector.extract_strided_slice %0 {offsets = [0, 128], sizes = [8, 512], strides = [1, 1]} : vector<8x640xf32> to vector<8x512xf32>
    %c64 = arith.constant 64 : index
    %c0_17 = arith.constant 0 : index
    %31 = vector.load %arg2[%c64, %c0_17] : memref<72x8xf32, #tpu.memory_space<vmem>>, vector<8x8xf32>
    %cst_18 = arith.constant dense<0.000000e+00> : vector<8x512xf32>
    %32 = tpu.matmul %31, %30, %cst_18 {dimension_numbers = #tpu.dot_dimension_numbers<[1], [0], [0], [1], [0, 0, 1, 1], [], []>} : vector<8x8xf32>, vector<8x512xf32>, vector<8x512xf32> -> vector<8x512xf32>
    %33 = arith.addf %29, %32 : vector<8x512xf32>
    %34 = arith.addf %11, %22 : vector<8x512xf32>
    %35 = arith.addf %34, %33 : vector<8x512xf32>
    %c0_19 = arith.constant 0 : index
    %c0_20 = arith.constant 0 : index
    %36 = vector.load %arg3[%c0_19, %c0_20] : memref<8x1xf32, #tpu.memory_space<vmem>>, vector<8x1xf32>
    %37 = vector.broadcast %36 : vector<8x1xf32> to vector<8x512xf32>
    %38 = arith.addf %35, %37 : vector<8x512xf32>
    %cst_21 = arith.constant 0.000000e+00 : f32
    %39 = vector.broadcast %cst_21 : f32 to vector<8x512xf32>
    %40 = arith.cmpf ogt, %38, %39 : vector<8x512xf32>
    %cst_22 = arith.constant 1.000000e-01 : f32
    %41 = vector.broadcast %cst_22 : f32 to vector<8x512xf32>
    %42 = arith.mulf %41, %38 : vector<8x512xf32>
    %43 = arith.select %40, %38, %42 : vector<8x512xi1>, vector<8x512xf32>
    %c0_23 = arith.constant 0 : index
    %c0_24 = arith.constant 0 : index
    %44 = vector.load %arg6[%c0_23, %c0_24] : memref<1x512xf32, #tpu.memory_space<vmem>>, vector<1x512xf32>
    %45 = vector.broadcast %44 : vector<1x512xf32> to vector<8x512xf32>
    %46 = arith.mulf %43, %45 : vector<8x512xf32>
    %47 = vector.extract_strided_slice %46 {offsets = [0, 0], sizes = [8, 384], strides = [1, 1]} : vector<8x512xf32> to vector<8x384xf32>
    %c0_25 = arith.constant 0 : index
    %c0_26 = arith.constant 0 : index
    %48 = vector.load %arg4[%c0_25, %c0_26] : memref<72x8xf32, #tpu.memory_space<vmem>>, vector<8x8xf32>
    %cst_27 = arith.constant dense<0.000000e+00> : vector<8x384xf32>
    %49 = tpu.matmul %48, %47, %cst_27 {dimension_numbers = #tpu.dot_dimension_numbers<[1], [0], [0], [1], [0, 0, 1, 1], [], []>} : vector<8x8xf32>, vector<8x384xf32>, vector<8x384xf32> -> vector<8x384xf32>
    %50 = vector.extract_strided_slice %46 {offsets = [0, 1], sizes = [8, 384], strides = [1, 1]} : vector<8x512xf32> to vector<8x384xf32>
    %c8_28 = arith.constant 8 : index
    %c0_29 = arith.constant 0 : index
    %51 = vector.load %arg4[%c8_28, %c0_29] : memref<72x8xf32, #tpu.memory_space<vmem>>, vector<8x8xf32>
    %cst_30 = arith.constant dense<0.000000e+00> : vector<8x384xf32>
    %52 = tpu.matmul %51, %50, %cst_30 {dimension_numbers = #tpu.dot_dimension_numbers<[1], [0], [0], [1], [0, 0, 1, 1], [], []>} : vector<8x8xf32>, vector<8x384xf32>, vector<8x384xf32> -> vector<8x384xf32>
    %53 = arith.addf %49, %52 : vector<8x384xf32>
    %54 = vector.extract_strided_slice %46 {offsets = [0, 2], sizes = [8, 384], strides = [1, 1]} : vector<8x512xf32> to vector<8x384xf32>
    %c16_31 = arith.constant 16 : index
    %c0_32 = arith.constant 0 : index
    %55 = vector.load %arg4[%c16_31, %c0_32] : memref<72x8xf32, #tpu.memory_space<vmem>>, vector<8x8xf32>
    %cst_33 = arith.constant dense<0.000000e+00> : vector<8x384xf32>
    %56 = tpu.matmul %55, %54, %cst_33 {dimension_numbers = #tpu.dot_dimension_numbers<[1], [0], [0], [1], [0, 0, 1, 1], [], []>} : vector<8x8xf32>, vector<8x384xf32>, vector<8x384xf32> -> vector<8x384xf32>
    %57 = arith.addf %53, %56 : vector<8x384xf32>
    %58 = vector.extract_strided_slice %46 {offsets = [0, 18], sizes = [8, 384], strides = [1, 1]} : vector<8x512xf32> to vector<8x384xf32>
    %c24_34 = arith.constant 24 : index
    %c0_35 = arith.constant 0 : index
    %59 = vector.load %arg4[%c24_34, %c0_35] : memref<72x8xf32, #tpu.memory_space<vmem>>, vector<8x8xf32>
    %cst_36 = arith.constant dense<0.000000e+00> : vector<8x384xf32>
    %60 = tpu.matmul %59, %58, %cst_36 {dimension_numbers = #tpu.dot_dimension_numbers<[1], [0], [0], [1], [0, 0, 1, 1], [], []>} : vector<8x8xf32>, vector<8x384xf32>, vector<8x384xf32> -> vector<8x384xf32>
    %61 = vector.extract_strided_slice %46 {offsets = [0, 19], sizes = [8, 384], strides = [1, 1]} : vector<8x512xf32> to vector<8x384xf32>
    %c32_37 = arith.constant 32 : index
    %c0_38 = arith.constant 0 : index
    %62 = vector.load %arg4[%c32_37, %c0_38] : memref<72x8xf32, #tpu.memory_space<vmem>>, vector<8x8xf32>
    %cst_39 = arith.constant dense<0.000000e+00> : vector<8x384xf32>
    %63 = tpu.matmul %62, %61, %cst_39 {dimension_numbers = #tpu.dot_dimension_numbers<[1], [0], [0], [1], [0, 0, 1, 1], [], []>} : vector<8x8xf32>, vector<8x384xf32>, vector<8x384xf32> -> vector<8x384xf32>
    %64 = arith.addf %60, %63 : vector<8x384xf32>
    %65 = vector.extract_strided_slice %46 {offsets = [0, 20], sizes = [8, 384], strides = [1, 1]} : vector<8x512xf32> to vector<8x384xf32>
    %c40_40 = arith.constant 40 : index
    %c0_41 = arith.constant 0 : index
    %66 = vector.load %arg4[%c40_40, %c0_41] : memref<72x8xf32, #tpu.memory_space<vmem>>, vector<8x8xf32>
    %cst_42 = arith.constant dense<0.000000e+00> : vector<8x384xf32>
    %67 = tpu.matmul %66, %65, %cst_42 {dimension_numbers = #tpu.dot_dimension_numbers<[1], [0], [0], [1], [0, 0, 1, 1], [], []>} : vector<8x8xf32>, vector<8x384xf32>, vector<8x384xf32> -> vector<8x384xf32>
    %68 = arith.addf %64, %67 : vector<8x384xf32>
    %69 = vector.extract_strided_slice %46 {offsets = [0, 36], sizes = [8, 384], strides = [1, 1]} : vector<8x512xf32> to vector<8x384xf32>
    %c48_43 = arith.constant 48 : index
    %c0_44 = arith.constant 0 : index
    %70 = vector.load %arg4[%c48_43, %c0_44] : memref<72x8xf32, #tpu.memory_space<vmem>>, vector<8x8xf32>
    %cst_45 = arith.constant dense<0.000000e+00> : vector<8x384xf32>
    %71 = tpu.matmul %70, %69, %cst_45 {dimension_numbers = #tpu.dot_dimension_numbers<[1], [0], [0], [1], [0, 0, 1, 1], [], []>} : vector<8x8xf32>, vector<8x384xf32>, vector<8x384xf32> -> vector<8x384xf32>
    %72 = vector.extract_strided_slice %46 {offsets = [0, 37], sizes = [8, 384], strides = [1, 1]} : vector<8x512xf32> to vector<8x384xf32>
    %c56_46 = arith.constant 56 : index
    %c0_47 = arith.constant 0 : index
    %73 = vector.load %arg4[%c56_46, %c0_47] : memref<72x8xf32, #tpu.memory_space<vmem>>, vector<8x8xf32>
    %cst_48 = arith.constant dense<0.000000e+00> : vector<8x384xf32>
    %74 = tpu.matmul %73, %72, %cst_48 {dimension_numbers = #tpu.dot_dimension_numbers<[1], [0], [0], [1], [0, 0, 1, 1], [], []>} : vector<8x8xf32>, vector<8x384xf32>, vector<8x384xf32> -> vector<8x384xf32>
    %75 = arith.addf %71, %74 : vector<8x384xf32>
    %76 = vector.extract_strided_slice %46 {offsets = [0, 38], sizes = [8, 384], strides = [1, 1]} : vector<8x512xf32> to vector<8x384xf32>
    %c64_49 = arith.constant 64 : index
    %c0_50 = arith.constant 0 : index
    %77 = vector.load %arg4[%c64_49, %c0_50] : memref<72x8xf32, #tpu.memory_space<vmem>>, vector<8x8xf32>
    %cst_51 = arith.constant dense<0.000000e+00> : vector<8x384xf32>
    %78 = tpu.matmul %77, %76, %cst_51 {dimension_numbers = #tpu.dot_dimension_numbers<[1], [0], [0], [1], [0, 0, 1, 1], [], []>} : vector<8x8xf32>, vector<8x384xf32>, vector<8x384xf32> -> vector<8x384xf32>
    %79 = arith.addf %75, %78 : vector<8x384xf32>
    %80 = arith.addf %57, %68 : vector<8x384xf32>
    %81 = arith.addf %80, %79 : vector<8x384xf32>
    %c0_52 = arith.constant 0 : index
    %c0_53 = arith.constant 0 : index
    %82 = vector.load %arg5[%c0_52, %c0_53] : memref<8x1xf32, #tpu.memory_space<vmem>>, vector<8x1xf32>
    %83 = vector.broadcast %82 : vector<8x1xf32> to vector<8x384xf32>
    %84 = arith.addf %81, %83 : vector<8x384xf32>
    %85 = vector.extract_strided_slice %0 {offsets = [0, 128], sizes = [8, 384], strides = [1, 1]} : vector<8x640xf32> to vector<8x384xf32>
    %86 = arith.addf %84, %85 : vector<8x384xf32>
    %c0_54 = arith.constant 0 : index
    %c0_55 = arith.constant 0 : index
    %87 = vector.load %arg7[%c0_54, %c0_55] : memref<8x384xf32, #tpu.memory_space<vmem>>, vector<8x384xf32>
    tpu.vector_store %arg7[%c0_54, %c0_55], %86 {strides = array<i32>} : memref<8x384xf32, #tpu.memory_space<vmem>>, vector<8x384xf32>,
    return
  }
  func.func @transform_0(%arg0: i32) -> (i32, i32) {
    %c0_i32 = arith.constant 0 : i32
    %c0_i32_0 = arith.constant 0 : i32
    return %arg0, %c0_i32 : i32, i32
  }
  func.func @transform_1(%arg0: i32) -> (i32, i32) {
    %c0_i32 = arith.constant 0 : i32
    %c0_i32_0 = arith.constant 0 : i32
    %c0_i32_1 = arith.constant 0 : i32
    return %c0_i32, %c0_i32_0 : i32, i32
  }
  func.func @transform_2(%arg0: i32) -> (i32, i32) {
    %c0_i32 = arith.constant 0 : i32
    %c0_i32_0 = arith.constant 0 : i32
    %c0_i32_1 = arith.constant 0 : i32
    return %c0_i32, %c0_i32_0 : i32, i32
  }
  func.func @transform_3(%arg0: i32) -> (i32, i32) {
    %c0_i32 = arith.constant 0 : i32
    %c0_i32_0 = arith.constant 0 : i32
    %c0_i32_1 = arith.constant 0 : i32
    return %c0_i32, %c0_i32_0 : i32, i32
  }
  func.func @transform_4(%arg0: i32) -> (i32, i32) {
    %c0_i32 = arith.constant 0 : i32
    %c0_i32_0 = arith.constant 0 : i32
    %c0_i32_1 = arith.constant 0 : i32
    return %c0_i32, %c0_i32_0 : i32, i32
  }
  func.func @transform_5(%arg0: i32) -> (i32, i32) {
    %c0_i32 = arith.constant 0 : i32
    %c0_i32_0 = arith.constant 0 : i32
    %c0_i32_1 = arith.constant 0 : i32
    return %c0_i32, %c0_i32_0 : i32, i32
  }
  func.func @transform_6(%arg0: i32) -> (i32, i32) {
    %c0_i32 = arith.constant 0 : i32
    %c0_i32_0 = arith.constant 0 : i32
    return %arg0, %c0_i32 : i32, i32
  }
}

</mosaic_0001>

<bundles_post_ra>
// kernel: tile.13
= control target key start
LH: loop header
LB: loop body
LE: loop exit
PB: predicated region body
PF: predicated region fallthrough
CT: control target
= control target key end

     0   :  { %s22_s0 = inlined_call_operand.vmem [shape: f32[4], index: 0, kind: input, shape index: {}]   ;;  %s23_s1 = inlined_call_operand.vmem [shape: f32[2,4], index: 1, kind: output, shape index: {}]  }
   0x1   :  { %v4_v0 = vld [vmem:[%s22_s0] ss:$0 sm:$0xff] }
   0x2   :  { %5 = vst [vmem:[%s23_s1] sm:$0x3] %v4_v0 }

// kernel: tile.0
= control target key start
LH: loop header
LB: loop body
LE: loop exit
PB: predicated region body
PF: predicated region fallthrough
CT: control target
= control target key end

     0   :  { %s34_s8 = smov 125   ;;  %vm7_vm0 = vcmask 7168   ;;  %s35_s11 = smov 126   ;;  %s61_s0 = inlined_call_operand.vmem [shape: f32[2,4], index: 0, kind: input, shape index: {}]   ;;  %s62_s1 = inlined_call_operand.vmem [shape: f32[8,1], index: 1, kind: output, shape index: {}]  }
   0x1   :  { %v4_v0 = vld [vmem:[%s61_s0] sm:$0x3]  ;;  %s33_s0 = smov 127  }
   0x2   :  { %5 = vst [vmem:[#allocation0] sm:$0x3] %v4_v0 }
   0x9   :  { %v9_v1 = vld [vmem:[#allocation0] sm:$0x3]  }
   0xa   :  { %v21_v2 = vld [vmem:[#allocation0] sm:$0x3]   ;;  %10 = vrot.lane.b32.xlu0 %v9_v1, %s33_s0 }
   0xb   :  { %22 = vrot.lane.b32.xlu1 %v21_v2, %s34_s8  ;;  %v6_v3 = vld [vmem:[#allocation0] sm:$0x3]  }
   0xc   :  { %v15_v4 = vld [vmem:[#allocation0] sm:$0x3]   ;;  %8 = vst.msk [vmem:[%s62_s1] ss:$4 sm:$0x3] %vm7_vm0, %v6_v3  }
   0xe   :  { %16 = vrot.lane.b32.xlu0 %v15_v4, %s35_s11 }
  0x7c   :  { %v11_v5 = vpop.permute.xlu0 %10  }
  0x7d   :  { %v23_v6 = vpop.permute.xlu1 %22   ;;  %27 = vst.msk [vmem:[%s62_s1 + $0x1] ss:$4 sm:$0x3] %vm7_vm0, %v11_v5  }
  0x7e   :  { %29 = vst.msk [vmem:[%s62_s1 + $0x3] ss:$4 sm:$0x3] %vm7_vm0, %v23_v6  }
  0x80   :  { %v17_v7 = vpop.permute.xlu0 %16  }
  0x81   :  { %28 = vst.msk [vmem:[%s62_s1 + $0x2] ss:$4 sm:$0x3] %vm7_vm0, %v17_v7  }

// kernel: resblock_pallas.1
= control target key start
LH: loop header
LB: loop body
LE: loop exit
PB: predicated region body
PF: predicated region fallthrough
CT: control target
= control target key end

     0   :  { %s3198_s25 = smov 37   ;;  %v3199_v4 = vmov 0.0   ;;  %s3200_s8 = smov 38   ;;  %v3207_v6 = vmov 0   ;;  %vm45_vm0 = vcmask 302080   ;;  %vm54_vm1 = vcmask 64512   ;;  %s3569_s0 = inlined_call_operand.vmem [shape: f32[8,640], index: 0, kind: input, shape index: {}]   ;;  %s3570_s2 = inlined_call_operand.vmem [shape: f32[8,1], index: 2, kind: input, shape index: {}]   ;;  %s3571_s1 = inlined_call_operand.vmem [shape: f32[72,8], index: 1, kind: input, shape index: {}]   ;;  %s3572_s5 = inlined_call_operand.vmem [shape: f32[1,512], index: 5, kind: input, shape index: {}]   ;;  %s3573_s4 = inlined_call_operand.vmem [shape: f32[8,1], index: 4, kind: input, shape index: {}]   ;;  %s3574_s3 = inlined_call_operand.vmem [shape: f32[72,8], index: 3, kind: input, shape index: {}]   ;;  %s3575_s6 = inlined_call_operand.vmem [shape: f32[8,384], index: 6, kind: output, shape index: {}]  }
   0x1   :  { %v3255_v0 = vld [vmem:[%s3569_s0 + $0x8] sm:$0xff]  ;;  %v23_v1 = vld [vmem:[%s3569_s0] sm:$0xff]  ;;  %v3264_v2 = vld [vmem:[%s3569_s0 + $0x10] sm:$0xff]  ;;  %122 = vmatprep.mubr.f32.mxu0 %v3199_v4  ;;  %193 = vmatprep.mubr.f32.mxu1 %v3199_v4  ;;  %s3201_s9 = smov 36   ;;  %s3203_s10 = smov 20   ;;  %vm210_vm2 = vcmask 310272  }
   0x2   :  { %37 = vrot.lane.b32.xlu0 %v3255_v0, %s3198_s25  ;;  %35 = vrot.lane.b32.xlu1 %v23_v1, %s3198_s25  ;;  %v3269_v3 = vld [vmem:[%s3569_s0 + $0x18] sm:$0xff]  ;;  %v3278_v5 = vld [vmem:[%s3569_s0 + $0x20] sm:$0xff]  ;;  %s3202_s0 = smov 19   ;;  %s3204_s11 = smov 18   ;;  %vm375_vm3 = vcmask 293888   ;;  %vm545_vm4 = vcmask 154624  }
   0x3   :  { %s3205_s12 = smov 1   ;;  %s3206_s13 = smov 2   ;;  %3197 = vset.pattern.permute.xlu0 %v3207_v6  ;;  %v1520_v7 = vld [vmem:[%s3570_s2] sm:$0xff]  ;;  %v29_v13 = vld [vmem:[%s3571_s1 + $0x8] sm:$0xff]  ;;  %v364_v33 = vld [vmem:[%s3571_s1 + $0x10] sm:$0xff]  ;;  %vm709_vm5 = vcmask 162816  }
   0x4   :  { %v28_v23 = vld [vmem:[%s3571_s1] sm:$0xff]  ;;  %v533_v53 = vld [vmem:[%s3571_s1 + $0x18] sm:$0xff]  ;;  %vm874_vm6 = vcmask 146432   ;;  %v863_v63 = vld [vmem:[%s3571_s1 + $0x28] sm:$0xff]  ;;  %vm1044_vm7 = vcmask 7168   ;;  %vm1208_vm8 = vcmask 15360  }
   0x5   :  { %v534_v43 = vld [vmem:[%s3571_s1 + $0x20] sm:$0xff]  ;;  %vm3212_vm12 = vmmov 0   ;;  %s3215_s14 = smov 92   ;;  %s3216_s15 = smov 90   ;;  %vm1582_vm14 = vcmask 1039360   ;;  %vm1886_vm15 = vcmask 1031168  }
   0x6   :  { %39 = vrot.lane.b32.xlu0 %v3264_v2, %s3198_s25  ;;  %41 = vrot.lane.b32.xlu1 %v3269_v3, %s3198_s25 }
   0xa   :  { %43 = vrot.lane.b32.xlu0 %v3278_v5, %s3198_s25  ;;  %202 = vrot.lane.b32.xlu1 %v3255_v0, %s3200_s8 }
   0xe   :  { %204 = vrot.lane.b32.xlu0 %v3264_v2, %s3200_s8  ;;  %200 = vrot.lane.b32.xlu1 %v23_v1, %s3200_s8 }
  0x12   :  { %206 = vrot.lane.b32.xlu0 %v3269_v3, %s3200_s8  ;;  %208 = vrot.lane.b32.xlu1 %v3278_v5, %s3200_s8 }
  0x16   :  { %367 = vrot.lane.b32.xlu0 %v3255_v0, %s3201_s9  ;;  %369 = vrot.lane.b32.xlu1 %v3264_v2, %s3201_s9 }
  0x1a   :  { %365 = vrot.lane.b32.xlu0 %v23_v1, %s3201_s9  ;;  %371 = vrot.lane.b32.xlu1 %v3269_v3, %s3201_s9 }
  0x1e   :  { %373 = vrot.lane.b32.xlu0 %v3278_v5, %s3201_s9  ;;  %537 = vrot.lane.b32.xlu1 %v3255_v0, %s3202_s0 }
  0x22   :  { %539 = vrot.lane.b32.xlu0 %v3264_v2, %s3202_s0  ;;  %535 = vrot.lane.b32.xlu1 %v23_v1, %s3202_s0 }
  0x26   :  { %541 = vrot.lane.b32.xlu0 %v3269_v3, %s3202_s0  ;;  %543 = vrot.lane.b32.xlu1 %v3278_v5, %s3202_s0 }
  0x2a   :  { %701 = vrot.lane.b32.xlu0 %v3255_v0, %s3203_s10  ;;  %703 = vrot.lane.b32.xlu1 %v3264_v2, %s3203_s10 }
  0x2e   :  { %699 = vrot.lane.b32.xlu0 %v23_v1, %s3203_s10  ;;  %705 = vrot.lane.b32.xlu1 %v3269_v3, %s3203_s10 }
  0x32   :  { %707 = vrot.lane.b32.xlu0 %v3278_v5, %s3203_s10  ;;  %866 = vrot.lane.b32.xlu1 %v3255_v0, %s3204_s11  ;;  %s3210_s10 = smov 109  }
  0x36   :  { %868 = vrot.lane.b32.xlu0 %v3264_v2, %s3204_s11  ;;  %864 = vrot.lane.b32.xlu1 %v23_v1, %s3204_s11 }
  0x3a   :  { %870 = vrot.lane.b32.xlu0 %v3269_v3, %s3204_s11  ;;  %872 = vrot.lane.b32.xlu1 %v3278_v5, %s3204_s11  ;;  %s3211_s11 = smov 110  }
  0x3e   :  { %1036 = vrot.lane.b32.xlu0 %v3255_v0, %s3205_s12  ;;  %1038 = vrot.lane.b32.xlu1 %v3264_v2, %s3205_s12 }
  0x42   :  { %1034 = vrot.lane.b32.xlu0 %v23_v1, %s3205_s12  ;;  %1040 = vrot.lane.b32.xlu1 %v3269_v3, %s3205_s12 }
  0x46   :  { %1042 = vrot.lane.b32.xlu0 %v3278_v5, %s3205_s12  ;;  %1200 = vrot.lane.b32.xlu1 %v3255_v0, %s3206_s13  ;;  %s3213_s12 = smov 108  }
  0x4a   :  { %1202 = vrot.lane.b32.xlu0 %v3264_v2, %s3206_s13  ;;  %1198 = vrot.lane.b32.xlu1 %v23_v1, %s3206_s13 }
  0x4e   :  { %1204 = vrot.lane.b32.xlu0 %v3269_v3, %s3206_s13  ;;  %1206 = vrot.lane.b32.xlu1 %v3278_v5, %s3206_s13  ;;  %s3214_s13 = smov 91  }
  0x52   :  { %1523 = vperm.xlu0 %3197, %v1520_v7  }
  0x74   :  { %v38_v8 = vpop.permute.xlu0 %37  ;;  %v36_v9 = vpop.permute.xlu1 %35 }
  0x75   :  { %v46_v14 = vsel %vm45_vm0, %v36_v9, %v38_v8 }
  0x78   :  { %v40_v10 = vpop.permute.xlu0 %39  ;;  %v42_v11 = vpop.permute.xlu1 %41 }
  0x79   :  { %v47_v12 = vsel %vm45_vm0, %v38_v8, %v40_v10  ;;  %v48_v18 = vsel %vm45_vm0, %v40_v10, %v42_v11 }
  0x7a   :  { %58 = vmatprep.subr.mxu0 %v47_v12 }
  0x7b   :  { %59 = vmatpush1.msra.mxu0 %v46_v14  ;;  %v1033_v14 = vld [vmem:[%s3571_s1 + $0x38] sm:$0xff] }
  0x7c   :  { %v44_v15 = vpop.permute.xlu0 %43  ;;  %v203_v16 = vpop.permute.xlu1 %202  ;;  %3031 = vmatmul.mubr.msk.f32.vlgmr.msra.gmra.mrb[0].mxu0 %vm54_vm1, %v29_v13 }
  0x7d   :  { %v49_v17 = vsel %vm45_vm0, %v42_v11, %v44_v15  ;;  %286 = vmatprep.mubr.f32.mxu0 %v3199_v4  ;;  %vm2050_vm0 = vcmask 891904  }
  0x7e   :  { %129 = vmatprep.subr.mxu1 %v49_v17 }
  0x7f   :  { %130 = vmatpush1.msra.mxu1 %v48_v18 }
  0x80   :  { %v205_v19 = vpop.permute.xlu0 %204  ;;  %v201_v20 = vpop.permute.xlu1 %200  ;;  %3032 = vmatmul.mubr.msk.f32.vlgmr.msra.gmra.mrb[0].mxu1 %vm54_vm1, %v29_v13 }
  0x81   :  { %v211_v21 = vsel %vm210_vm2, %v201_v20, %v203_v16  ;;  %v212_v22 = vsel %vm210_vm2, %v203_v16, %v205_v19  ;;  %357 = vmatprep.mubr.f32.mxu1 %v3199_v4 }
  0x82   :  { %222 = vmatprep.subr.mxu0 %v212_v22 }
  0x83   :  { %223 = vmatpush1.msra.mxu0 %v211_v21 }
  0x84   :  { %v207_v24 = vpop.permute.xlu0 %206  ;;  %v209_v25 = vpop.permute.xlu1 %208  ;;  %3033 = vmatmul.mubr.msk.f32.vlgmr.msra.gmra.mrb[0].mxu0 %vm54_vm1, %v28_v23 }
  0x85   :  { %v213_v26 = vsel %vm210_vm2, %v205_v19, %v207_v24  ;;  %v214_v27 = vsel %vm210_vm2, %v207_v24, %v209_v25  ;;  %451 = vmatprep.mubr.f32.mxu0 %v3199_v4  ;;  %v1032_v24 = vld [vmem:[%s3571_s1 + $0x30] sm:$0xff]  ;;  %vm2209_vm2 = vcmask 900096  }
  0x86   :  { %293 = vmatprep.subr.mxu1 %v214_v27 }
  0x87   :  { %294 = vmatpush1.msra.mxu1 %v213_v26 }
  0x88   :  { %v368_v28 = vpop.permute.xlu0 %367  ;;  %v370_v29 = vpop.permute.xlu1 %369  ;;  %3034 = vmatmul.mubr.msk.f32.vlgmr.msra.gmra.mrb[0].mxu1 %vm54_vm1, %v28_v23 }
  0x89   :  { %v377_v30 = vsel %vm375_vm3, %v368_v28, %v370_v29  ;;  %522 = vmatprep.mubr.f32.mxu1 %v3199_v4 }
  0x8a   :  { %387 = vmatprep.subr.mxu0 %v377_v30  ;;  %v1544_v30 = vlaneseq }
  0x8c   :  { %v366_v31 = vpop.permute.xlu0 %365  ;;  %v372_v32 = vpop.permute.xlu1 %371 }
  0x8d   :  { %v376_v34 = vsel %vm375_vm3, %v366_v31, %v368_v28  ;;  %v378_v38 = vsel %vm375_vm3, %v370_v29, %v372_v32  ;;  %v1362_v29 = vld [vmem:[%s3571_s1 + $0x40] sm:$0xff]  ;;  %v1545_v31 = vshrl.u32 %v1544_v30, 7  ;;  %s3208_s1 = smov 127  }
  0x8e   :  { %388 = vmatpush1.msra.mxu0 %v376_v34  ;;  %v2041_v30 = vld [vmem:[%s3574_s3 + $0x20] sm:$0xff] }
  0x8f   :  { %3035 = vmatmul.mubr.msk.f32.vlgmr.msra.gmra.mrb[0].mxu0 %vm54_vm1, %v364_v33  ;;  %v1550_v34 = vsub.s32 1, %v1545_v31 }
  0x90   :  { %v374_v35 = vpop.permute.xlu0 %373  ;;  %v538_v36 = vpop.permute.xlu1 %537  ;;  %621 = vmatprep.mubr.f32.mxu0 %v3199_v4 }
  0x91   :  { %v379_v37 = vsel %vm375_vm3, %v372_v32, %v374_v35  ;;  %vm2369_vm3 = vcmask 883712  }
  0x92   :  { %458 = vmatprep.subr.mxu1 %v379_v37 }
  0x93   :  { %459 = vmatpush1.msra.mxu1 %v378_v38 }
  0x94   :  { %v540_v39 = vpop.permute.xlu0 %539  ;;  %v536_v40 = vpop.permute.xlu1 %535  ;;  %3036 = vmatmul.mubr.msk.f32.vlgmr.msra.gmra.mrb[0].mxu1 %vm54_vm1, %v364_v33  ;;  %v1542_v33 = vld [vmem:[%s3572_s5] sm:$0xf]  ;;  %s3209_s5 = smov 126  }
  0x95   :  { %v546_v41 = vsel %vm545_vm4, %v536_v40, %v538_v36  ;;  %v547_v42 = vsel %vm545_vm4, %v538_v36, %v540_v39  ;;  %692 = vmatprep.mubr.f32.mxu1 %v3199_v4  ;;  %v1554_v40 = vsub.s32 2, %v1545_v31 }
  0x96   :  { %557 = vmatprep.subr.mxu0 %v547_v42  ;;  %v1551_v42 = vrot.slane %v1542_v33, %v1550_v34 }
  0x97   :  { %558 = vmatpush1.msra.mxu0 %v546_v41 }
  0x98   :  { %v542_v44 = vpop.permute.xlu0 %541  ;;  %v544_v45 = vpop.permute.xlu1 %543  ;;  %3037 = vmatmul.mubr.msk.f32.vlgmr.msra.gmra.mrb[0].mxu0 %vm54_vm1, %v534_v43 }
  0x99   :  { %v548_v46 = vsel %vm545_vm4, %v540_v39, %v542_v44  ;;  %v549_v47 = vsel %vm545_vm4, %v542_v44, %v544_v45  ;;  %785 = vmatprep.mubr.f32.mxu0 %v3199_v4  ;;  %vm2533_vm4 = vcmask 744448  }
  0x9a   :  { %628 = vmatprep.subr.mxu1 %v549_v47 }
  0x9b   :  { %629 = vmatpush1.msra.mxu1 %v548_v46 }
  0x9c   :  { %v702_v48 = vpop.permute.xlu0 %701  ;;  %v704_v49 = vpop.permute.xlu1 %703  ;;  %3038 = vmatmul.mubr.msk.f32.vlgmr.msra.gmra.mrb[0].mxu1 %vm54_vm1, %v534_v43 }
  0x9d   :  { %v711_v50 = vsel %vm709_vm5, %v702_v48, %v704_v49  ;;  %856 = vmatprep.mubr.f32.mxu1 %v3199_v4 }
  0x9e   :  { %721 = vmatprep.subr.mxu0 %v711_v50  ;;  %v1555_v50 = vrot.slane %v1542_v33, %v1554_v40 }
  0xa0   :  { %v700_v51 = vpop.permute.xlu0 %699  ;;  %v706_v52 = vpop.permute.xlu1 %705 }
  0xa1   :  { %v710_v54 = vsel %vm709_vm5, %v700_v51, %v702_v48  ;;  %v712_v58 = vsel %vm709_vm5, %v704_v49, %v706_v52 }
  0xa2   :  { %722 = vmatpush1.msra.mxu0 %v710_v54 }
  0xa3   :  { %3039 = vmatmul.mubr.msk.f32.vlgmr.msra.gmra.mrb[0].mxu0 %vm54_vm1, %v533_v53 }
  0xa4   :  { %v708_v55 = vpop.permute.xlu0 %707  ;;  %v867_v56 = vpop.permute.xlu1 %866  ;;  %950 = vmatprep.mubr.f32.mxu0 %v3199_v4 }
  0xa5   :  { %v713_v57 = vsel %vm709_vm5, %v706_v52, %v708_v55  ;;  %vm2692_vm5 = vcmask 752640  }
  0xa6   :  { %792 = vmatprep.subr.mxu1 %v713_v57 }
  0xa7   :  { %793 = vmatpush1.msra.mxu1 %v712_v58 }
  0xa8   :  { %v869_v59 = vpop.permute.xlu0 %868  ;;  %v865_v60 = vpop.permute.xlu1 %864  ;;  %3040 = vmatmul.mubr.msk.f32.vlgmr.msra.gmra.mrb[0].mxu1 %vm54_vm1, %v533_v53 }
  0xa9   :  { %v875_v61 = vsel %vm874_vm6, %v865_v60, %v867_v56  ;;  %v876_v62 = vsel %vm874_vm6, %v867_v56, %v869_v59  ;;  %1021 = vmatprep.mubr.f32.mxu1 %v3199_v4  ;;  %v1558_v56 = vsub.s32 3, %v1545_v31 }
  0xaa   :  { %886 = vmatprep.subr.mxu0 %v876_v62 }
  0xab   :  { %887 = vmatpush1.msra.mxu0 %v875_v61  ;;  %v1559_v58 = vrot.slane %v1542_v33, %v1558_v56  ;;  %v3012_v61 = vld [vmem:[%s3573_s4] sm:$0xff] }
  0xac   :  { %v871_v1 = vpop.permute.xlu0 %870  ;;  %v873_v6 = vpop.permute.xlu1 %872  ;;  %3041 = vmatmul.mubr.msk.f32.vlgmr.msra.gmra.mrb[0].mxu0 %vm54_vm1, %v863_v63 }
  0xad   :  { %v877_v7 = vsel %vm874_vm6, %v869_v59, %v871_v1  ;;  %v878_v8 = vsel %vm874_vm6, %v871_v1, %v873_v6  ;;  %1120 = vmatprep.mubr.f32.mxu0 %v3199_v4  ;;  %vm2852_vm6 = vcmask 736256  }
  0xae   :  { %957 = vmatprep.subr.mxu1 %v878_v8  ;;  %v1569_v8 = vld [vmem:[%s3574_s3 + $0x8] sm:$0xff] }
  0xaf   :  { %958 = vmatpush1.msra.mxu1 %v877_v7 }
  0xb0   :  { %v1037_v9 = vpop.permute.xlu0 %1036  ;;  %v1039_v10 = vpop.permute.xlu1 %1038  ;;  %3042 = vmatmul.mubr.msk.f32.vlgmr.msra.gmra.mrb[0].mxu1 %vm54_vm1, %v863_v63 }
  0xb1   :  { %v1046_v11 = vsel %vm1044_vm7, %v1037_v9, %v1039_v10  ;;  %1191 = vmatprep.mubr.f32.mxu1 %v3199_v4 }
  0xb2   :  { %1056 = vmatprep.subr.mxu0 %v1046_v11 }
  0xb4   :  { %v1035_v12 = vpop.permute.xlu0 %1034  ;;  %v1041_v13 = vpop.permute.xlu1 %1040 }
  0xb5   :  { %v1045_v15 = vsel %vm1044_vm7, %v1035_v12, %v1037_v9  ;;  %v1047_v19 = vsel %vm1044_vm7, %v1039_v10, %v1041_v13 }
  0xb6   :  { %1057 = vmatpush1.msra.mxu0 %v1045_v15  ;;  %v1568_v15 = vld [vmem:[%s3574_s3] sm:$0xff] }
  0xb7   :  { %3043 = vmatmul.mubr.msk.f32.vlgmr.msra.gmra.mrb[0].mxu0 %vm54_vm1, %v1033_v14 }
  0xb8   :  { %v1043_v16 = vpop.permute.xlu0 %1042  ;;  %v1201_v17 = vpop.permute.xlu1 %1200  ;;  %1284 = vmatprep.mubr.f32.mxu0 %v3199_v4 }
  0xb9   :  { %v1048_v18 = vsel %vm1044_vm7, %v1041_v13, %v1043_v16 }
  0xba   :  { %1127 = vmatprep.subr.mxu1 %v1048_v18 }
  0xbb   :  { %1128 = vmatpush1.msra.mxu1 %v1047_v19 }
  0xbc   :  { %v1203_v20 = vpop.permute.xlu0 %1202  ;;  %3044 = vmatmul.mubr.msk.f32.vlgmr.msra.gmra.mrb[0].mxu1 %vm54_vm1, %v1033_v14  ;;  %v1199_v21 = vpop.permute.xlu1 %1198 }
  0xbd   :  { %v1209_v22 = vsel %vm1208_vm8, %v1199_v21, %v1201_v17  ;;  %v1210_v23 = vsel %vm1208_vm8, %v1201_v17, %v1203_v20  ;;  %1355 = vmatprep.mubr.f32.mxu1 %v3199_v4 }
  0xbe   :  { %1220 = vmatprep.subr.mxu0 %v1210_v23 }
  0xbf   :  { %1221 = vmatpush1.msra.mxu0 %v1209_v22  ;;  %v1877_v22 = vld [vmem:[%s3574_s3 + $0x10] sm:$0xff] }
  0xc0   :  { %v1205_v25 = vpop.permute.xlu0 %1204  ;;  %3045 = vmatmul.mubr.msk.f32.vlgmr.msra.gmra.mrb[0].mxu0 %vm54_vm1, %v1032_v24  ;;  %v1207_v26 = vpop.permute.xlu1 %1206  ;;  %1366 = vmatprep.subr.mxu0 %v3264_v2 }
  0xc1   :  { %v1211_v27 = vsel %vm1208_vm8, %v1203_v20, %v1205_v25  ;;  %v1212_v28 = vsel %vm1208_vm8, %v1205_v25, %v1207_v26  ;;  %1367 = vmatpush1.msra.mxu0 %v3255_v0  ;;  %1430 = vmatprep.mubr.f32.mxu0 %v3199_v4 }
  0xc2   :  { %1291 = vmatprep.subr.mxu1 %v1212_v28 }
  0xc3   :  { %1292 = vmatpush1.msra.mxu1 %v1211_v27 }
  0xc4   :  { %3046 = vmatmul.mubr.msk.f32.vlgmr.msra.gmra.mrb[0].mxu1 %vm54_vm1, %v1032_v24  ;;  %1437 = vmatprep.subr.mxu1 %v3278_v5  ;;  %v1546_v5 = vsub.s32 0, %v1545_v31 }
  0xc5   :  { %1438 = vmatpush1.msra.mxu1 %v3269_v3  ;;  %1501 = vmatprep.mubr.f32.mxu1 %v3199_v4 }
  0xc6   :  { %3085 = vmatprep.subr.mxu1 %v3199_v4  ;;  %v1547_v38 = vrot.slane %v1542_v33, %v1546_v5 }
  0xc8   :  { %3047 = vmatmul.mubr.msk.f32.vlgmr.msra.gmra.mrb[0].mxu0 %vm54_vm1, %v1362_v29 }
  0xc9   :  { %1656 = vmatprep.mubr.f32.mxu0 %v3199_v4 }
  0xcc   :  { %3048 = vmatmul.mubr.msk.f32.vlgmr.msra.gmra.mrb[0].mxu1 %vm54_vm1, %v1362_v29 }
  0xcd   :  { %3087 = vmatprep.mubr.msk.f32.mxu1 %vm3212_vm12, %v3199_v4 }
  0xd1   :  { %v1524_v32 = vpop.permute.xlu0 %1523 }
 0x19b   :  { %v1432_v35 = vpop.f32.mrb[0].mxu0 }
 0x19c   :  { %v1526_v36 = vadd.f32 %v1524_v32, %v1432_v35  ;;  %v1434_v37 = vpop.f32.mrb[1].mxu0 }
 0x19d   :  { %v1527_v39 = vadd.f32 %v1524_v32, %v1434_v37  ;;  %v2040_v37 = vld [vmem:[%s3574_s3 + $0x18] sm:$0xff] }
 0x19e   :  { %vm1530_vm9 = vcmp.gt.f32.partialorder %v1526_v36, 0.0  ;;  %v1534_v41 = vmul.f32 0.1, %v1526_v36 }
 0x19f   :  { %vm1531_vm10 = vcmp.gt.f32.partialorder %v1527_v39, 0.0  ;;  %v1535_v43 = vmul.f32 0.1, %v1527_v39  ;;  %v1503_v44 = vpop.f32.mrb[0].mxu1 }
 0x1a0   :  { %v1538_v45 = vsel %vm1530_vm9, %v1526_v36, %v1534_v41  ;;  %v1528_v46 = vadd.f32 %v1524_v32, %v1503_v44  ;;  %v1505_v47 = vpop.f32.mrb[1].mxu1 }
 0x1a1   :  { %v3398_v48 = vmul.f32 %v1547_v38, %v1538_v45  ;;  %v1539_v49 = vsel %vm1531_vm10, %v1527_v39, %v1535_v43  ;;  %v1529_v55 = vadd.f32 %v1524_v32, %v1505_v47 }
 0x1a2   :  { %v3400_v51 = vmul.f32 %v1551_v42, %v1539_v49  ;;  %vm1532_vm11 = vcmp.gt.f32.partialorder %v1528_v46, 0.0  ;;  %v1536_v52 = vmul.f32 0.1, %v1528_v46 }
 0x1a3   :  { %1574 = vrot.lane.b32.xlu0 %v3398_v48, %s3208_s1  ;;  %v1537_v57 = vmul.f32 0.1, %v1529_v55  ;;  %vm1533_vm13 = vcmp.gt.f32.partialorder %v1529_v55, 0.0 }
 0x1a4   :  { %v1540_v53 = vsel %vm1532_vm11, %v1528_v46, %v1536_v52  ;;  %1576 = vrot.lane.b32.xlu1 %v3400_v51, %s3208_s1  ;;  %v2360_v46 = vld [vmem:[%s3574_s3 + $0x28] sm:$0xff] }
 0x1a5   :  { %v3406_v54 = vmul.f32 %v1555_v50, %v1540_v53  ;;  %v1541_v59 = vsel %vm1533_vm13, %v1529_v55, %v1537_v57 }
 0x1a6   :  { %v1567_v60 = vmul.f32 %v1559_v58, %v1541_v59 }
 0x1a7   :  { %1882 = vrot.lane.b32.xlu0 %v3406_v54, %s3209_s5 }
 0x1a8   :  { %1578 = vrot.lane.b32.xlu1 %v3406_v54, %s3208_s1 }
 0x1ab   :  { %2042 = vrot.lane.b32.xlu0 %v3398_v48, %s3210_s10 }
 0x1ac   :  { %1878 = vrot.lane.b32.xlu1 %v3398_v48, %s3209_s5 }
 0x1af   :  { %2201 = vrot.lane.b32.xlu0 %v3398_v48, %s3211_s11 }
 0x1b0   :  { %1880 = vrot.lane.b32.xlu1 %v3400_v51, %s3209_s5 }
 0x1b3   :  { %2044 = vrot.lane.b32.xlu0 %v3400_v51, %s3210_s10 }
 0x1b4   :  { %2046 = vrot.lane.b32.xlu1 %v3406_v54, %s3210_s10 }
 0x1b7   :  { %2361 = vrot.lane.b32.xlu0 %v3398_v48, %s3213_s12 }
 0x1b8   :  { %2205 = vrot.lane.b32.xlu1 %v3406_v54, %s3211_s11 }
 0x1bb   :  { %2203 = vrot.lane.b32.xlu0 %v3400_v51, %s3211_s11 }
 0x1bc   :  { %2365 = vrot.lane.b32.xlu1 %v3406_v54, %s3213_s12 }
 0x1bf   :  { %2529 = vrot.lane.b32.xlu0 %v3406_v54, %s3214_s13 }
 0x1c0   :  { %1580 = vrot.lane.b32.xlu1 %v1567_v60, %s3208_s1 }
 0x1c3   :  { %2363 = vrot.lane.b32.xlu0 %v3400_v51, %s3213_s12 }
 0x1c4   :  { %2525 = vrot.lane.b32.xlu1 %v3398_v48, %s3214_s13 }
 0x1c7   :  { %2207 = vrot.lane.b32.xlu0 %v1567_v60, %s3211_s11 }
 0x1c8   :  { %1884 = vrot.lane.b32.xlu1 %v1567_v60, %s3209_s5 }
 0x1cb   :  { %2367 = vrot.lane.b32.xlu0 %v1567_v60, %s3213_s12 }
 0x1cc   :  { %2048 = vrot.lane.b32.xlu1 %v1567_v60, %s3210_s10 }
 0x1cf   :  { %2684 = vrot.lane.b32.xlu0 %v3398_v48, %s3215_s14 }
 0x1d0   :  { %2527 = vrot.lane.b32.xlu1 %v3400_v51, %s3214_s13 }
 0x1d3   :  { %2686 = vrot.lane.b32.xlu0 %v3400_v51, %s3215_s14 }
 0x1d4   :  { %2688 = vrot.lane.b32.xlu1 %v3406_v54, %s3215_s14 }
 0x1d7   :  { %2848 = vrot.lane.b32.xlu0 %v3406_v54, %s3216_s15 }
 0x1d8   :  { %2531 = vrot.lane.b32.xlu1 %v1567_v60, %s3214_s13 }
 0x1db   :  { %2846 = vrot.lane.b32.xlu0 %v3400_v51, %s3216_s15 }
 0x1dc   :  { %2690 = vrot.lane.b32.xlu1 %v1567_v60, %s3215_s14 }
 0x1df   :  { %3015 = vperm.xlu0 %3197, %v3012_v61  }
 0x1e0   :  { %2850 = vrot.lane.b32.xlu1 %v1567_v60, %s3216_s15  ;;  %v2523_v60 = vld [vmem:[%s3574_s3 + $0x30] sm:$0xff] }
 0x1e4   :  { %2844 = vrot.lane.b32.xlu1 %v3398_v48, %s3216_s15 }
 0x215   :  { %v1575_v62 = vpop.permute.xlu0 %1574 }
 0x216   :  { %v1577_v63 = vpop.permute.xlu1 %1576 }
 0x217   :  { %v1583_v9 = vsel %vm1582_vm14, %v1575_v62, %v1577_v63 }
 0x219   :  { %v3445_v1 = vpop.permute.xlu0 %1882 }
 0x21a   :  { %v1579_v6 = vpop.permute.xlu1 %1578 }
 0x21b   :  { %v1584_v7 = vsel %vm1582_vm14, %v1577_v63, %v1579_v6  ;;  %v2843_v63 = vld [vmem:[%s3574_s3 + $0x40] sm:$0xff] }
 0x21c   :  { %1592 = vmatprep.subr.mxu0 %v1584_v7 }
 0x21d   :  { %v2043_v10 = vpop.permute.xlu0 %2042  ;;  %1593 = vmatpush1.msra.mxu0 %v1583_v9 }
 0x21e   :  { %3049 = vmatmul.mubr.msk.f32.vlgmr.msra.gmra.mrb[2].mxu0 %vm54_vm1, %v1569_v8  ;;  %1736 = vmatprep.subr.mxu0 %v3400_v51  ;;  %v1879_v11 = vpop.permute.xlu1 %1878 }
 0x21f   :  { %1737 = vmatpush1.msra.mxu0 %v3398_v48  ;;  %1800 = vmatprep.mubr.f32.mxu0 %v3199_v4 }
 0x221   :  { %v2202_v12 = vpop.permute.xlu0 %2201 }
 0x222   :  { %v1881_v13 = vpop.permute.xlu1 %1880 }
 0x223   :  { %v1888_v14 = vsel %vm1886_vm15, %v1881_v13, %v3445_v1  ;;  %v1887_v17 = vsel %vm1886_vm15, %v1879_v11, %v1881_v13 }
 0x224   :  { %1896 = vmatprep.subr.mxu0 %v1888_v14 }
 0x225   :  { %v2045_v16 = vpop.permute.xlu0 %2044 }
 0x226   :  { %3051 = vmatmul.mubr.msk.f32.vlgmr.msra.gmra.mrb[2].mxu0 %vm54_vm1, %v1568_v15  ;;  %v2047_v18 = vpop.permute.xlu1 %2046  ;;  %v2051_v24 = vsel %vm2050_vm0, %v2043_v10, %v2045_v16 }
 0x227   :  { %1897 = vmatpush1.msra.mxu0 %v1887_v17  ;;  %v2052_v19 = vsel %vm2050_vm0, %v2045_v16, %v2047_v18  ;;  %1960 = vmatprep.mubr.f32.mxu0 %v3199_v4 }
 0x228   :  { %2060 = vmatprep.subr.mxu0 %v2052_v19 }
 0x229   :  { %v2362_v20 = vpop.permute.xlu0 %2361 }
 0x22a   :  { %v2206_v21 = vpop.permute.xlu1 %2205 }
 0x22d   :  { %v2204_v23 = vpop.permute.xlu0 %2203 }
 0x22e   :  { %3053 = vmatmul.mubr.msk.f32.vlgmr.msra.gmra.mrb[2].mxu0 %vm54_vm1, %v1877_v22  ;;  %v2366_v25 = vpop.permute.xlu1 %2365  ;;  %v2211_v26 = vsel %vm2209_vm2, %v2204_v23, %v2206_v21  ;;  %v2210_v32 = vsel %vm2209_vm2, %v2202_v12, %v2204_v23 }
 0x22f   :  { %2061 = vmatpush1.msra.mxu0 %v2051_v24  ;;  %2124 = vmatprep.mubr.f32.mxu0 %v3199_v4 }
 0x230   :  { %2219 = vmatprep.subr.mxu0 %v2211_v26 }
 0x231   :  { %v3472_v27 = vpop.permute.xlu0 %2529 }
 0x232   :  { %v1581_v28 = vpop.permute.xlu1 %1580 }
 0x233   :  { %v1585_v29 = vsel %vm1582_vm14, %v1579_v6, %v1581_v28 }
 0x234   :  { %3086 = vmatpush3.msra.mxu1 %v1585_v29 }
 0x235   :  { %v2364_v31 = vpop.permute.xlu0 %2363  ;;  %3088 = vmatmul.mubr.msk.f32.vlgmr.msra.gmra.mrb[2].mxu1 %vm54_vm1, %v1569_v8  ;;  %3090 = vmatprep.subr.mxu1 %v3199_v4 }
 0x236   :  { %3091 = vmatpush3.msra.mxu1 %v3406_v54  ;;  %3055 = vmatmul.mubr.msk.f32.vlgmr.msra.gmra.mrb[2].mxu0 %vm54_vm1, %v2041_v30  ;;  %v2526_v5 = vpop.permute.xlu1 %2525  ;;  %v2371_v33 = vsel %vm2369_vm3, %v2364_v31, %v2366_v25  ;;  %v2370_v39 = vsel %vm2369_vm3, %v2362_v20, %v2364_v31  ;;  %v2524_v54 = vld [vmem:[%s3574_s3 + $0x38] sm:$0xff] }
 0x237   :  { %2220 = vmatpush1.msra.mxu0 %v2210_v32  ;;  %3092 = vmatprep.mubr.msk.f32.mxu1 %vm3212_vm12, %v3199_v4 }
 0x238   :  { %2379 = vmatprep.subr.mxu0 %v2371_v33  ;;  %3095 = vmatprep.subr.mxu1 %v3199_v4 }
 0x239   :  { %v2208_v34 = vpop.permute.xlu0 %2207  ;;  %3093 = vmatmul.mubr.msk.f32.vlgmr.msra.gmra.mrb[4].mxu1 %vm54_vm1, %v1568_v15  ;;  %2283 = vmatprep.mubr.f32.mxu0 %v3199_v4 }
 0x23a   :  { %v1885_v35 = vpop.permute.xlu1 %1884  ;;  %3097 = vmatprep.mubr.msk.f32.mxu1 %vm3212_vm12, %v3199_v4  ;;  %v2212_v42 = vsel %vm2209_vm2, %v2206_v21, %v2208_v34 }
 0x23b   :  { %v1889_v36 = vsel %vm1886_vm15, %v3445_v1, %v1885_v35 }
 0x23c   :  { %3096 = vmatpush3.msra.mxu1 %v1889_v36 }
 0x23d   :  { %v2368_v38 = vpop.permute.xlu0 %2367  ;;  %3098 = vmatmul.mubr.msk.f32.vlgmr.msra.gmra.mrb[6].mxu1 %vm54_vm1, %v1877_v22  ;;  %3100 = vmatprep.subr.mxu1 %v3199_v4 }
 0x23e   :  { %3057 = vmatmul.mubr.msk.f32.vlgmr.msra.gmra.mrb[2].mxu0 %vm54_vm1, %v2040_v37  ;;  %v2049_v40 = vpop.permute.xlu1 %2048  ;;  %3102 = vmatprep.mubr.msk.f32.mxu1 %vm3212_vm12, %v3199_v4  ;;  %v2372_v47 = vsel %vm2369_vm3, %v2366_v25, %v2368_v38 }
 0x23f   :  { %2380 = vmatpush1.msra.mxu0 %v2370_v39  ;;  %v2053_v41 = vsel %vm2050_vm0, %v2047_v18, %v2049_v40  ;;  %2443 = vmatprep.mubr.f32.mxu0 %v3199_v4 }
 0x240   :  { %3101 = vmatpush3.msra.mxu1 %v2053_v41 }
 0x241   :  { %v2685_v43 = vpop.permute.xlu0 %2684  ;;  %3103 = vmatmul.mubr.msk.f32.vlgmr.msra.gmra.mrb[8].mxu1 %vm54_vm1, %v2041_v30  ;;  %3105 = vmatprep.subr.mxu1 %v3199_v4 }
 0x242   :  { %3106 = vmatpush3.msra.mxu1 %v2212_v42  ;;  %v2528_v44 = vpop.permute.xlu1 %2527  ;;  %3107 = vmatprep.mubr.msk.f32.mxu1 %vm3212_vm12, %v3199_v4 }
 0x243   :  { %3110 = vmatprep.subr.mxu1 %v3199_v4  ;;  %v2535_v45 = vsel %vm2533_vm4, %v2528_v44, %v3472_v27  ;;  %v2534_v49 = vsel %vm2533_vm4, %v2526_v5, %v2528_v44 }
 0x244   :  { %2543 = vmatprep.subr.mxu0 %v2535_v45 }
 0x245   :  { %v2687_v48 = vpop.permute.xlu0 %2686  ;;  %3108 = vmatmul.mubr.msk.f32.vlgmr.msra.gmra.mrb[10].mxu1 %vm54_vm1, %v2040_v37 }
 0x246   :  { %3111 = vmatpush3.msra.mxu1 %v2372_v47  ;;  %3059 = vmatmul.mubr.msk.f32.vlgmr.msra.gmra.mrb[2].mxu0 %vm54_vm1, %v2360_v46  ;;  %v2689_v50 = vpop.permute.xlu1 %2688  ;;  %v2693_v57 = vsel %vm2692_vm5, %v2685_v43, %v2687_v48 }
 0x247   :  { %2544 = vmatpush1.msra.mxu0 %v2534_v49  ;;  %3112 = vmatprep.mubr.msk.f32.mxu1 %vm3212_vm12, %v3199_v4  ;;  %v2694_v51 = vsel %vm2692_vm5, %v2687_v48, %v2689_v50 }
 0x248   :  { %2702 = vmatprep.subr.mxu0 %v2694_v51  ;;  %3115 = vmatprep.subr.mxu1 %v3199_v4 }
 0x249   :  { %v2849_v52 = vpop.permute.xlu0 %2848  ;;  %3113 = vmatmul.mubr.msk.f32.vlgmr.msra.gmra.mrb[12].mxu1 %vm54_vm1, %v2360_v46  ;;  %2607 = vmatprep.mubr.f32.mxu0 %v3199_v4 }
 0x24a   :  { %v2532_v53 = vpop.permute.xlu1 %2531  ;;  %3117 = vmatprep.mubr.msk.f32.mxu1 %vm3212_vm12, %v3199_v4 }
 0x24b   :  { %v2536_v55 = vsel %vm2533_vm4, %v3472_v27, %v2532_v53 }
 0x24c   :  { %3116 = vmatpush3.msra.mxu1 %v2536_v55 }
 0x24d   :  { %v2847_v56 = vpop.permute.xlu0 %2846  ;;  %3118 = vmatmul.mubr.msk.f32.vlgmr.msra.gmra.mrb[14].mxu1 %vm54_vm1, %v2524_v54  ;;  %3120 = vmatprep.subr.mxu1 %v3199_v4 }
 0x24e   :  { %3061 = vmatmul.mubr.msk.f32.vlgmr.msra.gmra.mrb[2].mxu0 %vm54_vm1, %v2524_v54  ;;  %v2691_v58 = vpop.permute.xlu1 %2690  ;;  %v2854_v59 = vsel %vm2852_vm6, %v2847_v56, %v2849_v52  ;;  %3122 = vmatprep.mubr.msk.f32.mxu1 %vm3212_vm12, %v3199_v4 }
 0x24f   :  { %2703 = vmatpush1.msra.mxu0 %v2693_v57  ;;  %v2695_v61 = vsel %vm2692_vm5, %v2689_v50, %v2691_v58  ;;  %2766 = vmatprep.mubr.f32.mxu0 %v3199_v4 }
 0x250   :  { %2862 = vmatprep.subr.mxu0 %v2854_v59  ;;  %3121 = vmatpush3.msra.mxu1 %v2695_v61 }
 0x251   :  { %3123 = vmatmul.mubr.msk.f32.vlgmr.msra.gmra.mrb[16].mxu1 %vm54_vm1, %v2523_v60  ;;  %3125 = vmatprep.subr.mxu1 %v3199_v4 }
 0x252   :  { %v2851_v62 = vpop.permute.xlu1 %2850  ;;  %3127 = vmatprep.mubr.msk.f32.mxu1 %vm3212_vm12, %v3199_v4 }
 0x253   :  { %v2855_v1 = vsel %vm2852_vm6, %v2849_v52, %v2851_v62 }
 0x254   :  { %3126 = vmatpush3.msra.mxu1 %v2855_v1 }
 0x255   :  { %3128 = vmatmul.mubr.msk.f32.vlgmr.msra.gmra.mrb[18].mxu1 %vm54_vm1, %v2843_v63 }
 0x256   :  { %3063 = vmatmul.mubr.msk.f32.vlgmr.msra.gmra.mrb[2].mxu0 %vm54_vm1, %v2523_v60  ;;  %v2845_v6 = vpop.permute.xlu1 %2844 }
 0x257   :  { %v2853_v7 = vsel %vm2852_vm6, %v2845_v6, %v2847_v56  ;;  %2926 = vmatprep.mubr.f32.mxu0 %v3199_v4 }
 0x258   :  { %2863 = vmatpush1.msra.mxu0 %v2853_v7 }
 0x25e   :  { %3065 = vmatmul.mubr.msk.f32.vlgmr.msra.gmra.mrb[2].mxu0 %vm54_vm1, %v2843_v63  ;;  %v3016_v5 = vpop.permute.xlu0 %3015 }
 0x308   :  { %v1729_v8 = vpop.f32.mrb[2].mxu1 }
 0x309   :  { %v3089_v9 = vpop.f32.mrb[3].mxu1 }
 0x30c   :  { %v1873_v10 = vpop.f32.mrb[4].mxu1 }
 0x30d   :  { %v1874_v11 = vadd.f32 %v1873_v10, %v1729_v8  ;;  %v3094_v12 = vpop.f32.mrb[5].mxu1 }
 0x310   :  { %v2033_v13 = vpop.f32.mrb[6].mxu1 }
 0x311   :  { %v2039_v14 = vadd.f32 %v2033_v13, %v1874_v11  ;;  %v3099_v15 = vpop.f32.mrb[7].mxu1 }
 0x314   :  { %v2197_v16 = vpop.f32.mrb[8].mxu1 }
 0x315   :  { %v3104_v17 = vpop.f32.mrb[9].mxu1 }
 0x318   :  { %v2356_v18 = vpop.f32.mrb[10].mxu1 }
 0x319   :  { %v2357_v19 = vadd.f32 %v2356_v18, %v2197_v16  ;;  %v3109_v20 = vpop.f32.mrb[11].mxu1 }
 0x31c   :  { %v2516_v21 = vpop.f32.mrb[12].mxu1 }
 0x31d   :  { %v2522_v22 = vadd.f32 %v2516_v21, %v2357_v19  ;;  %v3114_v23 = vpop.f32.mrb[13].mxu1 }
 0x31f   :  { %v3008_v4 = vadd.f32 %v2522_v22, %v2039_v14 }
 0x320   :  { %v2680_v24 = vpop.f32.mrb[14].mxu1 }
 0x321   :  { %v3119_v25 = vpop.f32.mrb[15].mxu1 }
 0x324   :  { %v2839_v26 = vpop.f32.mrb[16].mxu1 }
 0x325   :  { %v2840_v27 = vadd.f32 %v2839_v26, %v2680_v24  ;;  %v3124_v28 = vpop.f32.mrb[17].mxu1 }
 0x328   :  { %v2999_v29 = vpop.f32.mrb[18].mxu1 }
 0x329   :  { %v3005_v30 = vadd.f32 %v2999_v29, %v2840_v27  ;;  %v3129_v31 = vpop.f32.mrb[19].mxu1 }
 0x32b   :  { %v3011_v32 = vadd.f32 %v3008_v4, %v3005_v30 }
 0x32d   :  { %v3020_v33 = vadd.f32 %v3016_v5, %v3011_v32 }
 0x32f   :  { %v3023_v34 = vadd.f32 %v3020_v33, %v3269_v3 }
 0x331   :  { %v2928_v35 = vpop.f32.mrb[2].mxu0  ;;  %3026 = vst [vmem:[%s3575_s6 + $0x10] sm:$0xff] %v3023_v34 }
 0x332   :  { %v3018_v36 = vadd.f32 %v3016_v5, %v2928_v35  ;;  %v2930_v37 = vpop.f32.mrb[3].mxu0 }
 0x333   :  { %v3019_v38 = vadd.f32 %v3016_v5, %v2930_v37 }
 0x334   :  { %v3021_v39 = vadd.f32 %v3018_v36, %v3255_v0 }
 0x335   :  { %v3022_v40 = vadd.f32 %v3019_v38, %v3264_v2 }
 0x336   :  { %3024 = vst [vmem:[%s3575_s6] sm:$0xff] %v3021_v39 }
 0x337   :  { %3025 = vst [vmem:[%s3575_s6 + $0x8] sm:$0xff] %v3022_v40 }

</bundles_post_ra>
